<compile_context>
chip_gen: v6e
topology: v6e:2x2x1
jax: 0.10.0
libtpu: 0.0.40
codegen_flags: <defaults>
</compile_context>

<pallas_src>
import math
from functools import partial

import numpy as np
import jax
import jax.numpy as jnp
from jax.experimental import pallas as pl
from jax.experimental.pallas import tpu as pltpu


def _round_up(x, m):
    return ((x + m - 1) // m) * m


def _inference_kernel(slots_ref, tpr_ref, wpk_ref, bpk_ref, eexp_ref,
                      wz_ref, bz_ref, out_ref):
    f32 = jnp.float32
    re = eexp_ref.shape[1]           # role * entity (128)

    # One packed MXU projection: (BT, 4*SLOT) @ (4*SLOT, 4*RE).
    # Column layout: [r1x | r2x | r3x | e1x], each already expanded onto the
    # fused k = r*ENT + e index; attention-mask mixing folded into weights.
    proj = jnp.dot(slots_ref[...], wpk_ref[...],
                   preferred_element_type=f32) + bpk_ref[...]
    r1x = proj[:, 0:re]
    r2x = proj[:, re:2 * re]
    r3x = proj[:, 2 * re:3 * re]
    e1x = proj[:, 3 * re:4 * re]                                     # (BT, RE)

    tpr = tpr_ref[...].astype(f32)   # (BT, ENT_f, RE); f32 accumulation
    eexp = eexp_ref[...]             # (ENT, RE) 0/1 expansion: col k -> entity k % ENT

    def contract(o):
        # i[b, f] = sum_k o[b, k] * tpr[b, f, k]  (VPU multiply + lane reduce).
        # If a bundle dump shows the XLU reduce slot saturating, swap this for
        # a batched lax.dot_general so the k-reduction rides the idle MXU.
        return jnp.sum(tpr * o[:, None, :], axis=-1)                 # (BT, ENT_f)

    # TODO(synk): OptionalLayer(LayerNorm) is instantiated with config['LN']=False
    # (identity), so no LayerNorm is applied to i1/i2/i3.
    i1 = contract(e1x * r1x)                                         # e1 pre-expanded
    i2 = contract(jnp.dot(i1, eexp, preferred_element_type=f32) * r2x)
    i3 = contract(jnp.dot(i2, eexp, preferred_element_type=f32) * r3x)
    step_sum = i1 + i2 + i3                                          # (BT, ENT)

    logits = jnp.dot(step_sum, wz_ref[...],
                     preferred_element_type=f32) + bz_ref[...]       # (BT, VOCAB_PAD)
    out_ref[...] = logits.astype(out_ref.dtype)


def _forward_from_lane_dense(params, slots, tpr_lane, tpr_bf16):
    """Core: slots [B,4,SLOT], tpr_lane [B, ENT_f, ROLE*ENT] -> logits [B, VOCAB]."""
    B, n_slots, slot_size = slots.shape
    ent = params["we1"].shape[1]
    role = params["wr1"].shape[1]
    vocab = params["wz"].shape[1]
    re = role * ent
    kdim = n_slots * slot_size
    assert n_slots == 4
    assert tpr_lane.shape == (B, ent, re)

    f32 = jnp.float32
    eps = 1e-6
    base_mask = jnp.array([1.0 - 3 * eps, eps, eps, eps], f32)
    masks = jnp.stack([jnp.roll(base_mask, k) for k in range(4)], axis=0)  # (4, 4)

    def fold(mask_row, w):
        # (SLOT, C) -> (4*SLOT, C); row n*SLOT+s = mask_row[n] * w[s]
        return (mask_row[:, None, None] * w[None, :, :]).reshape(kdim, w.shape[1])

    # All four projections expanded onto the fused k = r*ENT + e index:
    #   role weights: col k -> role k // ENT   (jnp.repeat over ent)
    #   e1   weights: col k -> entity k % ENT  (jnp.tile over role)
    # Packed width = 4*RE = 512 (MXU aligned, full-vreg slices in the kernel).
    w_pack = jnp.concatenate(
        [fold(masks[1], jnp.repeat(params["wr1"], ent, axis=1)),
         fold(masks[2], jnp.repeat(params["wr2"], ent, axis=1)),
         fold(masks[3], jnp.repeat(params["wr3"], ent, axis=1)),
         fold(masks[0], jnp.tile(params["we1"], (1, role)))], axis=1)     # (4*SLOT, 4*RE)
    b_pack = jnp.concatenate(
        [jnp.repeat(params["br1"], ent, axis=1),
         jnp.repeat(params["br2"], ent, axis=1),
         jnp.repeat(params["br3"], ent, axis=1),
         jnp.tile(params["be1"], (1, role))], axis=1)                     # (1, 4*RE)

    # 0/1 expansion for the entity index (used for i2 / i3): col k -> k % ENT
    e_expand = jnp.tile(jnp.eye(ent, dtype=f32), (1, role))               # (ENT, RE)

    vocab_pad = _round_up(vocab, 128)
    wz_pad = jnp.pad(params["wz"], ((0, 0), (0, vocab_pad - vocab)))
    bz_pad = jnp.pad(params["bz"], ((0, 0), (0, vocab_pad - vocab)))

    slots_flat = slots.reshape(B, kdim)
    tpr_dtype = jnp.bfloat16 if tpr_bf16 else f32
    tpr_in = tpr_lane.astype(tpr_dtype)

    # Batch tiling: large tiles (per-step overhead ~0.35us dominates at small
    # tiles), but keep >= 2 grid steps when the batch allows so the "parallel"
    # axis can be split across v7x's two TensorCores.
    bt = min(512, _round_up(B, 8))
    if B > 16 and -(-B // bt) < 2:
        bt = _round_up(-(-B // 2), 8)
    b_pad = _round_up(B, bt)
    if b_pad != B:
        slots_flat = jnp.pad(slots_flat, ((0, b_pad - B), (0, 0)))
        tpr_in = jnp.pad(tpr_in, ((0, b_pad - B), (0, 0), (0, 0)))

    packed_cols = w_pack.shape[1]
    tpr_itemsize = jnp.dtype(tpr_dtype).itemsize
    flops = b_pad * (2 * kdim * packed_cols            # packed projection
                     + 3 * (re + 2 * ent * re)         # 3x (VPU mul + lane reduce)
                     + 2 * (2 * ent * re)              # entity expansion for i2/i3
                     + 2 * ent * vocab_pad)            # logits
    bytes_accessed = (b_pad * (kdim * 4 + ent * re * tpr_itemsize + vocab_pad * 4)
                      + 4 * (kdim * packed_cols + packed_cols
                             + ent * re + ent * vocab_pad + vocab_pad))

    # Explicit VMEM budget (double-buffered batch tiles + replicated weights),
    # >= 32 MiB so large tiles are not capped by v5e's 16 MiB default scoped
    # limit, <= 48 MiB to stay safely inside v7x's 64 MiB physical VMEM.
    tile_bytes = bt * (kdim * 4 + ent * re * tpr_itemsize + vocab_pad * 4)
    const_bytes = 4 * (kdim * packed_cols + packed_cols + ent * re
                       + ent * vocab_pad + vocab_pad)
    vmem_needed = 2 * (tile_bytes + const_bytes)
    vmem_limit = int(min(max(2 * vmem_needed, 32 * 1024 * 1024),
                         48 * 1024 * 1024))

    def rep(arr):
        # Replicated, grid-invariant block (its DMA is issued once; the second
        # pipeline buffer could be dropped with pipeline_mode=pl.Buffered(1),
        # kept at the default here for portability).
        nd = arr.ndim
        return pl.BlockSpec(arr.shape, lambda i, _nd=nd: (0,) * _nd)

    out = pl.pallas_call(
        _inference_kernel,
        out_shape=jax.ShapeDtypeStruct((b_pad, vocab_pad), f32),
        grid=(b_pad // bt,),
        in_specs=[
            pl.BlockSpec((bt, kdim), lambda i: (i, 0)),
            pl.BlockSpec((bt, ent, re), lambda i: (i, 0, 0)),
            rep(w_pack), rep(b_pack), rep(e_expand), rep(wz_pad), rep(bz_pad),
        ],
        out_specs=pl.BlockSpec((bt, vocab_pad), lambda i: (i, 0)),
        compiler_params=pltpu.CompilerParams(
            dimension_semantics=("parallel",),
            vmem_limit_bytes=vmem_limit),
        cost_estimate=pl.CostEstimate(flops=flops, transcendentals=0,
                                      bytes_accessed=bytes_accessed),
    )(slots_flat, tpr_in, w_pack, b_pack, e_expand, wz_pad, bz_pad)
    return out[:B, :vocab]


@partial(jax.jit, static_argnames=("tpr_bf16",))
def inference_forward(params, slots, tpr, tpr_bf16=False):
    """slots: [B, 4, SLOT] f32; tpr: [B, ENT, ROLE, ENT] f32 -> logits [B, VOCAB]."""
    B, ent, role, ent_f = tpr.shape
    assert ent_f == ent
    # Lane-dense TPR [B, ENT_f, ROLE*ENT] (k = r*ENT + e). This transpose is an
    # extra HBM pass over the largest tensor; upstream producers that already
    # hold the TPR lane-dense should call inference_forward_lane_dense instead.
    tpr_lane = jnp.transpose(tpr, (0, 3, 2, 1)).reshape(B, ent_f, role * ent)
    return _forward_from_lane_dense(params, slots, tpr_lane, tpr_bf16)


@partial(jax.jit, static_argnames=("tpr_bf16",))
def inference_forward_lane_dense(params, slots, tpr_lane, tpr_bf16=False):
    """Same forward, but takes the TPR already lane-dense: [B, ENT_f, ROLE*ENT]."""
    return _forward_from_lane_dense(params, slots, tpr_lane, tpr_bf16)


def init_params(key, slot_size, ent_size, role_size, vocab_size):
    """Deterministic nn.Linear-style init; weights stored as (fan_in, fan_out)."""
    def linear(k, fan_in, fan_out):
        kw, kb = jax.random.split(k)
        bound = 1.0 / math.sqrt(fan_in)
        w = jax.random.uniform(kw, (fan_in, fan_out), jnp.float32, -bound, bound)
        b = jax.random.uniform(kb, (1, fan_out), jnp.float32, -bound, bound)
        return w, b

    ks = jax.random.split(key, 5)
    we1, be1 = linear(ks[0], slot_size, ent_size)
    wr1, br1 = linear(ks[1], slot_size, role_size)
    wr2, br2 = linear(ks[2], slot_size, role_size)
    wr3, br3 = linear(ks[3], slot_size, role_size)
    wz, bz = linear(ks[4], ent_size, vocab_size)
    return dict(we1=we1, be1=be1, wr1=wr1, br1=br1, wr2=wr2, br2=br2,
                wr3=wr3, br3=br3, wz=wz, bz=bz)


def reference_forward(params, slots, tpr):
    """Pure-JAX mirror of the PyTorch forward (LN inactive)."""
    eps = 1e-6
    base = jnp.array([1.0 - 3 * eps, eps, eps, eps], jnp.float32)
    m0 = jnp.einsum('bne,n->be', slots, jnp.roll(base, 0))
    m1 = jnp.einsum('bne,n->be', slots, jnp.roll(base, 1))
    m2 = jnp.einsum('bne,n->be', slots, jnp.roll(base, 2))
    m3 = jnp.einsum('bne,n->be', slots, jnp.roll(base, 3))
    e1 = m0 @ params["we1"] + params["be1"]
    r1 = m1 @ params["wr1"] + params["br1"]
    r2 = m2 @ params["wr2"] + params["br2"]
    r3 = m3 @ params["wr3"] + params["br3"]
    i1 = jnp.einsum('be,br,berf->bf', e1, r1, tpr)
    i2 = jnp.einsum('be,br,berf->bf', i1, r2, tpr)
    i3 = jnp.einsum('be,br,berf->bf', i2, r3, tpr)
    step = i1 + i2 + i3
    return step @ params["wz"] + params["bz"]


if __name__ == "__main__":
    B = 2
    N_SLOTS = 4
    SLOT = 32
    ENT = 16
    ROLE = 8
    VOCAB = 32

    key = jax.random.PRNGKey(0)
    k_slots, k_tpr, k_params = jax.random.split(key, 3)

    slots = jax.random.normal(k_slots, (B, N_SLOTS, SLOT), jnp.float32)
    tpr = jax.random.normal(k_tpr, (B, ENT, ROLE, ENT), jnp.float32) * 0.1
    params = init_params(k_params, SLOT, ENT, ROLE, VOCAB)

    ref = reference_forward(params, slots, tpr)

    # Exact f32 path.
    logits = jax.block_until_ready(inference_forward(params, slots, tpr))
    np.testing.assert_allclose(np.asarray(logits), np.asarray(ref),
                               rtol=1e-3, atol=1e-3)

    # Lane-dense entry point (skips the wrapper transpose round trip).
    tpr_lane = jnp.transpose(tpr, (0, 3, 2, 1)).reshape(B, ENT, ROLE * ENT)
    logits_ld = jax.block_until_ready(
        inference_forward_lane_dense(params, slots, tpr_lane))
    np.testing.assert_allclose(np.asarray(logits_ld), np.asarray(ref),
                               rtol=1e-3, atol=1e-3)

    # Bandwidth-optimized variant: TPR streamed in bf16, f32 accumulation.
    logits_bf16 = jax.block_until_ready(
        inference_forward(params, slots, tpr, tpr_bf16=True))
    np.testing.assert_allclose(np.asarray(logits_bf16), np.asarray(ref),
                               rtol=5e-2, atol=5e-2)

    print("KERNEL_OK")
</pallas_src>

<mosaic_0001>
module attributes {stable_mosaic.version = 11 : i64} {
  func.func @_inference_kernel(%arg0: i32, %arg1: memref<8x128xf32, #tpu.memory_space<vmem>>, %arg2: memref<8x16x128xf32, #tpu.memory_space<vmem>>, %arg3: memref<128x512xf32, #tpu.memory_space<vmem>>, %arg4: memref<1x512xf32, #tpu.memory_space<vmem>>, %arg5: memref<16x128xf32, #tpu.memory_space<vmem>>, %arg6: memref<16x128xf32, #tpu.memory_space<vmem>>, %arg7: memref<1x128xf32, #tpu.memory_space<vmem>>, %arg8: memref<8x128xf32, #tpu.memory_space<vmem>>) attributes {dimension_semantics = [#tpu.dimension_semantics<parallel>], iteration_bounds = array<i64: 1>, scalar_prefetch = 0 : i64, scratch_operands = 0 : i64, tpu.core_type = #tpu.core_type<tc>, window_params = [{transform_indices = @transform_0, window_bounds = array<i64: 8, 128>}, {transform_indices = @transform_1, window_bounds = array<i64: 8, 16, 128>}, {pipeline_mode = #tpu.pipeline_mode<synchronous>, transform_indices = @transform_2, window_bounds = array<i64: 128, 512>}, {pipeline_mode = #tpu.pipeline_mode<synchronous>, transform_indices = @transform_3, window_bounds = array<i64: 1, 512>}, {pipeline_mode = #tpu.pipeline_mode<synchronous>, transform_indices = @transform_4, window_bounds = array<i64: 16, 128>}, {pipeline_mode = #tpu.pipeline_mode<synchronous>, transform_indices = @transform_5, window_bounds = array<i64: 16, 128>}, {pipeline_mode = #tpu.pipeline_mode<synchronous>, transform_indices = @transform_6, window_bounds = array<i64: 1, 128>}, {transform_indices = @transform_7, window_bounds = array<i64: 8, 128>}]} {
    %c0 = arith.constant 0 : index
    %c0_0 = arith.constant 0 : index
    %0 = vector.load %arg1[%c0, %c0_0] : memref<8x128xf32, #tpu.memory_space<vmem>>, vector<8x128xf32>
    %c0_1 = arith.constant 0 : index
    %c0_2 = arith.constant 0 : index
    %1 = vector.load %arg3[%c0_1, %c0_2] : memref<128x512xf32, #tpu.memory_space<vmem>>, vector<128x512xf32>
    %cst = arith.constant dense<0.000000e+00> : vector<8x512xf32>
    %2 = tpu.matmul %0, %1, %cst {dimension_numbers = #tpu.dot_dimension_numbers<[1], [0], [0], [1], [0, 0, 1, 1], [], []>} : vector<8x128xf32>, vector<128x512xf32>, vector<8x512xf32> -> vector<8x512xf32>
    %c0_3 = arith.constant 0 : index
    %c0_4 = arith.constant 0 : index
    %3 = vector.load %arg4[%c0_3, %c0_4] : memref<1x512xf32, #tpu.memory_space<vmem>>, vector<1x512xf32>
    %4 = vector.broadcast %3 : vector<1x512xf32> to vector<8x512xf32>
    %5 = arith.addf %2, %4 : vector<8x512xf32>
    %6 = vector.extract_strided_slice %5 {offsets = [0, 0], sizes = [8, 128], strides = [1, 1]} : vector<8x512xf32> to vector<8x128xf32>
    %7 = vector.extract_strided_slice %5 {offsets = [0, 128], sizes = [8, 128], strides = [1, 1]} : vector<8x512xf32> to vector<8x128xf32>
    %8 = vector.extract_strided_slice %5 {offsets = [0, 256], sizes = [8, 128], strides = [1, 1]} : vector<8x512xf32> to vector<8x128xf32>
    %9 = vector.extract_strided_slice %5 {offsets = [0, 384], sizes = [8, 128], strides = [1, 1]} : vector<8x512xf32> to vector<8x128xf32>
    %c0_5 = arith.constant 0 : index
    %c0_6 = arith.constant 0 : index
    %c0_7 = arith.constant 0 : index
    %10 = vector.load %arg2[%c0_5, %c0_6, %c0_7] : memref<8x16x128xf32, #tpu.memory_space<vmem>>, vector<8x16x128xf32>
    %c0_8 = arith.constant 0 : index
    %c0_9 = arith.constant 0 : index
    %11 = vector.load %arg5[%c0_8, %c0_9] : memref<16x128xf32, #tpu.memory_space<vmem>>, vector<16x128xf32>
    %12 = arith.mulf %9, %6 : vector<8x128xf32>
    %13 = vector.shape_cast %12 : vector<8x128xf32> to vector<8x1x128xf32>
    %14 = vector.broadcast %13 : vector<8x1x128xf32> to vector<8x16x128xf32>
    %15 = arith.mulf %10, %14 : vector<8x16x128xf32>
    %cst_10 = arith.constant dense<0.000000e+00> : vector<8x16xf32>
    %16 = vector.multi_reduction <add>, %15, %cst_10 [2] : vector<8x16x128xf32> to vector<8x16xf32>
    %cst_11 = arith.constant dense<0.000000e+00> : vector<8x128xf32>
    %17 = tpu.matmul %16, %11, %cst_11 {dimension_numbers = #tpu.dot_dimension_numbers<[1], [0], [0], [1], [0, 0, 1, 1], [], []>} : vector<8x16xf32>, vector<16x128xf32>, vector<8x128xf32> -> vector<8x128xf32>
    %18 = arith.mulf %17, %7 : vector<8x128xf32>
    %19 = vector.shape_cast %18 : vector<8x128xf32> to vector<8x1x128xf32>
    %20 = vector.broadcast %19 : vector<8x1x128xf32> to vector<8x16x128xf32>
    %21 = arith.mulf %10, %20 : vector<8x16x128xf32>
    %cst_12 = arith.constant dense<0.000000e+00> : vector<8x16xf32>
    %22 = vector.multi_reduction <add>, %21, %cst_12 [2] : vector<8x16x128xf32> to vector<8x16xf32>
    %cst_13 = arith.constant dense<0.000000e+00> : vector<8x128xf32>
    %23 = tpu.matmul %22, %11, %cst_13 {dimension_numbers = #tpu.dot_dimension_numbers<[1], [0], [0], [1], [0, 0, 1, 1], [], []>} : vector<8x16xf32>, vector<16x128xf32>, vector<8x128xf32> -> vector<8x128xf32>
    %24 = arith.mulf %23, %8 : vector<8x128xf32>
    %25 = vector.shape_cast %24 : vector<8x128xf32> to vector<8x1x128xf32>
    %26 = vector.broadcast %25 : vector<8x1x128xf32> to vector<8x16x128xf32>
    %27 = arith.mulf %10, %26 : vector<8x16x128xf32>
    %cst_14 = arith.constant dense<0.000000e+00> : vector<8x16xf32>
    %28 = vector.multi_reduction <add>, %27, %cst_14 [2] : vector<8x16x128xf32> to vector<8x16xf32>
    %29 = arith.addf %16, %22 : vector<8x16xf32>
    %30 = arith.addf %29, %28 : vector<8x16xf32>
    %c0_15 = arith.constant 0 : index
    %c0_16 = arith.constant 0 : index
    %31 = vector.load %arg6[%c0_15, %c0_16] : memref<16x128xf32, #tpu.memory_space<vmem>>, vector<16x128xf32>
    %cst_17 = arith.constant dense<0.000000e+00> : vector<8x128xf32>
    %32 = tpu.matmul %30, %31, %cst_17 {dimension_numbers = #tpu.dot_dimension_numbers<[1], [0], [0], [1], [0, 0, 1, 1], [], []>} : vector<8x16xf32>, vector<16x128xf32>, vector<8x128xf32> -> vector<8x128xf32>
    %c0_18 = arith.constant 0 : index
    %c0_19 = arith.constant 0 : index
    %33 = vector.load %arg7[%c0_18, %c0_19] : memref<1x128xf32, #tpu.memory_space<vmem>>, vector<1x128xf32>
    %34 = vector.broadcast %33 : vector<1x128xf32> to vector<8x128xf32>
    %35 = arith.addf %32, %34 : vector<8x128xf32>
    %c0_20 = arith.constant 0 : index
    %c0_21 = arith.constant 0 : index
    %36 = vector.load %arg8[%c0_20, %c0_21] : memref<8x128xf32, #tpu.memory_space<vmem>>, vector<8x128xf32>
    tpu.vector_store %arg8[%c0_20, %c0_21], %35 {strides = array<i32>} : memref<8x128xf32, #tpu.memory_space<vmem>>, vector<8x128xf32>,
    return
  }
  func.func @transform_0(%arg0: i32) -> (i32, i32) {
    %c0_i32 = arith.constant 0 : i32
    %c0_i32_0 = arith.constant 0 : i32
    return %arg0, %c0_i32 : i32, i32
  }
  func.func @transform_1(%arg0: i32) -> (i32, i32, i32) {
    %c0_i32 = arith.constant 0 : i32
    %c0_i32_0 = arith.constant 0 : i32
    %c0_i32_1 = arith.constant 0 : i32
    return %arg0, %c0_i32, %c0_i32_0 : i32, i32, i32
  }
  func.func @transform_2(%arg0: i32) -> (i32, i32) {
    %c0_i32 = arith.constant 0 : i32
    %c0_i32_0 = arith.constant 0 : i32
    %c0_i32_1 = arith.constant 0 : i32
    return %c0_i32, %c0_i32_0 : i32, i32
  }
  func.func @transform_3(%arg0: i32) -> (i32, i32) {
    %c0_i32 = arith.constant 0 : i32
    %c0_i32_0 = arith.constant 0 : i32
    %c0_i32_1 = arith.constant 0 : i32
    return %c0_i32, %c0_i32_0 : i32, i32
  }
  func.func @transform_4(%arg0: i32) -> (i32, i32) {
    %c0_i32 = arith.constant 0 : i32
    %c0_i32_0 = arith.constant 0 : i32
    %c0_i32_1 = arith.constant 0 : i32
    return %c0_i32, %c0_i32_0 : i32, i32
  }
  func.func @transform_5(%arg0: i32) -> (i32, i32) {
    %c0_i32 = arith.constant 0 : i32
    %c0_i32_0 = arith.constant 0 : i32
    %c0_i32_1 = arith.constant 0 : i32
    return %c0_i32, %c0_i32_0 : i32, i32
  }
  func.func @transform_6(%arg0: i32) -> (i32, i32) {
    %c0_i32 = arith.constant 0 : i32
    %c0_i32_0 = arith.constant 0 : i32
    %c0_i32_1 = arith.constant 0 : i32
    return %c0_i32, %c0_i32_0 : i32, i32
  }
  func.func @transform_7(%arg0: i32) -> (i32, i32) {
    %c0_i32 = arith.constant 0 : i32
    %c0_i32_0 = arith.constant 0 : i32
    return %arg0, %c0_i32 : i32, i32
  }
}

</mosaic_0001>

<bundles_post_ra>
// kernel: tile.29
= control target key start
LH: loop header
LB: loop body
LE: loop exit
PB: predicated region body
PF: predicated region fallthrough
CT: control target
= control target key end

     0   :  { %vm4_vm0 = vcmask 1047556   ;;  %s209_s14 = smov 96   ;;  %s210_s19 = smov 112   ;;  %vm6_vm1 = vcmask 130048   ;;  %vm25_vm2 = vcmask 1048448   ;;  %vm46_vm3 = vcmask 917248   ;;  %s388_s0 = inlined_call_operand.vmem [shape: f32[16,8,16], index: 0, kind: input, shape index: {}]   ;;  %s389_s1 = inlined_call_operand.vmem [shape: f32[16,128], index: 1, kind: output, shape index: {}]  }
   0x1   :  { %v172_v0 = vld [vmem:[%s388_s0 + $0x6] ss:$8 sm:$0xf]   ;;  %v167_v3 = vld [vmem:[%s388_s0 + $0x7] ss:$8 sm:$0xf]  }
   0x2   :  { %v173_v1 = vld [vmem:[%s388_s0 + $0x6] ss:$8 sm:$0xf0]   ;;  %v168_v4 = vld [vmem:[%s388_s0 + $0x7] ss:$8 sm:$0xf0]  }
   0x3   :  { %v43_v2 = vsel %vm4_vm0, %v173_v1, %v172_v0  ;;  %v22_v5 = vsel %vm4_vm0, %v168_v4, %v167_v3  ;;  %v174_v6 = vld [vmem:[%s388_s0 + $0x46] ss:$8 sm:$0xf]   ;;  %v169_v9 = vld [vmem:[%s388_s0 + $0x47] ss:$8 sm:$0xf]  }
   0x4   :  { %44 = vrot.lane.b32.xlu1 %v43_v2, %s209_s14  ;;  %v175_v7 = vld [vmem:[%s388_s0 + $0x46] ss:$8 sm:$0xf0]   ;;  %23 = vrot.lane.b32.xlu0 %v22_v5, %s210_s19  ;;  %v170_v10 = vld [vmem:[%s388_s0 + $0x47] ss:$8 sm:$0xf0]  }
   0x5   :  { %v53_v8 = vsel %vm4_vm0, %v175_v7, %v174_v6  ;;  %v32_v11 = vsel %vm4_vm0, %v170_v10, %v169_v9  ;;  %v179_v12 = vld [vmem:[%s388_s0 + $0x45] ss:$8 sm:$0xf]   ;;  %v184_v18 = vld [vmem:[%s388_s0 + $0x44] ss:$8 sm:$0xf]  }
   0x6   :  { %v180_v13 = vld [vmem:[%s388_s0 + $0x45] ss:$8 sm:$0xf0]   ;;  %v185_v19 = vld [vmem:[%s388_s0 + $0x44] ss:$8 sm:$0xf0]  }
   0x7   :  { %v177_v14 = vld [vmem:[%s388_s0 + $0x5] ss:$8 sm:$0xf]   ;;  %v74_v16 = vsel %vm4_vm0, %v180_v13, %v179_v12  ;;  %v182_v20 = vld [vmem:[%s388_s0 + $0x4] ss:$8 sm:$0xf]   ;;  %v95_v22 = vsel %vm4_vm0, %v185_v19, %v184_v18 }
   0x8   :  { %54 = vrot.lane.b32.xlu1 %v53_v8, %s209_s14  ;;  %v178_v15 = vld [vmem:[%s388_s0 + $0x5] ss:$8 sm:$0xf0]   ;;  %33 = vrot.lane.b32.xlu0 %v32_v11, %s210_s19  ;;  %v183_v21 = vld [vmem:[%s388_s0 + $0x4] ss:$8 sm:$0xf0]  }
   0x9   :  { %v64_v17 = vsel %vm4_vm0, %v178_v15, %v177_v14  ;;  %s211_s11 = smov 80   ;;  %v85_v23 = vsel %vm4_vm0, %v183_v21, %v182_v20  ;;  %v189_v24 = vld [vmem:[%s388_s0 + $0x43] ss:$8 sm:$0xf]   ;;  %s212_s20 = smov 64   ;;  %vm67_vm4 = vcmask 786048  }
   0xa   :  { %v190_v25 = vld [vmem:[%s388_s0 + $0x43] ss:$8 sm:$0xf0]   ;;  %v194_v28 = vld [vmem:[%s388_s0 + $0x42] ss:$8 sm:$0xf]  }
   0xb   :  { %v187_v26 = vld [vmem:[%s388_s0 + $0x3] ss:$8 sm:$0xf]   ;;  %v195_v29 = vld [vmem:[%s388_s0 + $0x42] ss:$8 sm:$0xf0]   ;;  %v116_v30 = vsel %vm4_vm0, %v190_v25, %v189_v24 }
   0xc   :  { %75 = vrot.lane.b32.xlu1 %v74_v16, %s211_s11  ;;  %65 = vrot.lane.b32.xlu0 %v64_v17, %s211_s11  ;;  %v188_v27 = vld [vmem:[%s388_s0 + $0x3] ss:$8 sm:$0xf0]   ;;  %v192_v31 = vld [vmem:[%s388_s0 + $0x2] ss:$8 sm:$0xf]   ;;  %v137_v40 = vsel %vm4_vm0, %v195_v29, %v194_v28 }
   0xd   :  { %v2_v32 = vld [vmem:[%s388_s0] ss:$8 sm:$0xf]   ;;  %v106_v33 = vsel %vm4_vm0, %v188_v27, %v187_v26  ;;  %v193_v36 = vld [vmem:[%s388_s0 + $0x2] ss:$8 sm:$0xf0]  }
   0xe   :  { %v3_v34 = vld [vmem:[%s388_s0] ss:$8 sm:$0xf0]   ;;  %s213_s8 = smov 48   ;;  %v127_v41 = vsel %vm4_vm0, %v193_v36, %v192_v31  ;;  %s215_s21 = smov 16   ;;  %vm88_vm5 = vcmask 654848  }
   0xf   :  { %v164_v35 = vld [vmem:[%s388_s0 + $0x40] ss:$8 sm:$0xf]   ;;  %v5_v37 = vsel %vm4_vm0, %v3_v34, %v2_v32  ;;  %v199_v42 = vld [vmem:[%s388_s0 + $0x41] ss:$8 sm:$0xf]  }
  0x10   :  { %96 = vrot.lane.b32.xlu1 %v95_v22, %s212_s20  ;;  %86 = vrot.lane.b32.xlu0 %v85_v23, %s212_s20  ;;  %v165_v38 = vld [vmem:[%s388_s0 + $0x40] ss:$8 sm:$0xf0]   ;;  %7 = vst.msk [vmem:[%s389_s1] sm:$0xff] %vm6_vm1, %v5_v37   ;;  %vm109_vm6 = vcmask 523648   ;;  %vm130_vm7 = vcmask 392448  }
  0x11   :  { %v13_v39 = vsel %vm4_vm0, %v165_v38, %v164_v35  ;;  %v200_v43 = vld [vmem:[%s388_s0 + $0x41] ss:$8 sm:$0xf0]   ;;  %vm151_vm8 = vcmask 261248  }
  0x12   :  { %166 = vst.msk [vmem:[%s389_s1 + $0x8] sm:$0xff] %vm6_vm1, %v13_v39   ;;  %v197_v44 = vld [vmem:[%s388_s0 + $0x1] ss:$8 sm:$0xf]   ;;  %v158_v46 = vsel %vm4_vm0, %v200_v43, %v199_v42 }
  0x13   :  { %v198_v45 = vld [vmem:[%s388_s0 + $0x1] ss:$8 sm:$0xf0]   ;;  %s214_s0 = smov 32  }
  0x14   :  { %117 = vrot.lane.b32.xlu1 %v116_v30, %s213_s8  ;;  %107 = vrot.lane.b32.xlu0 %v106_v33, %s213_s8  ;;  %v148_v47 = vsel %vm4_vm0, %v198_v45, %v197_v44 }
  0x18   :  { %138 = vrot.lane.b32.xlu1 %v137_v40, %s214_s0  ;;  %128 = vrot.lane.b32.xlu0 %v127_v41, %s214_s0 }
  0x1c   :  { %159 = vrot.lane.b32.xlu1 %v158_v46, %s215_s21  ;;  %149 = vrot.lane.b32.xlu0 %v148_v47, %s215_s21 }
  0x76   :  { %v45_v48 = vpop.permute.xlu1 %44   ;;  %v24_v49 = vpop.permute.xlu0 %23  }
  0x77   :  { %26 = vst.msk [vmem:[%s389_s1] sm:$0xff] %vm25_vm2, %v24_v49  }
  0x78   :  { %47 = vst.msk [vmem:[%s389_s1] sm:$0xff] %vm46_vm3, %v45_v48  }
  0x7a   :  { %v55_v50 = vpop.permute.xlu1 %54   ;;  %v34_v51 = vpop.permute.xlu0 %33  }
  0x7b   :  { %171 = vst.msk [vmem:[%s389_s1 + $0x8] sm:$0xff] %vm25_vm2, %v34_v51  }
  0x7c   :  { %176 = vst.msk [vmem:[%s389_s1 + $0x8] sm:$0xff] %vm46_vm3, %v55_v50  }
  0x7e   :  { %v76_v52 = vpop.permute.xlu1 %75   ;;  %v66_v53 = vpop.permute.xlu0 %65  }
  0x7f   :  { %181 = vst.msk [vmem:[%s389_s1 + $0x8] sm:$0xff] %vm67_vm4, %v76_v52   ;;  %68 = vst.msk [vmem:[%s389_s1] sm:$0xff] %vm67_vm4, %v66_v53  }
  0x82   :  { %v97_v54 = vpop.permute.xlu1 %96   ;;  %v87_v55 = vpop.permute.xlu0 %86  }
  0x83   :  { %186 = vst.msk [vmem:[%s389_s1 + $0x8] sm:$0xff] %vm88_vm5, %v97_v54   ;;  %89 = vst.msk [vmem:[%s389_s1] sm:$0xff] %vm88_vm5, %v87_v55  }
  0x86   :  { %v118_v56 = vpop.permute.xlu1 %117   ;;  %v108_v57 = vpop.permute.xlu0 %107  }
  0x87   :  { %191 = vst.msk [vmem:[%s389_s1 + $0x8] sm:$0xff] %vm109_vm6, %v118_v56   ;;  %110 = vst.msk [vmem:[%s389_s1] sm:$0xff] %vm109_vm6, %v108_v57  }
  0x8a   :  { %v139_v58 = vpop.permute.xlu1 %138   ;;  %v129_v59 = vpop.permute.xlu0 %128  }
  0x8b   :  { %196 = vst.msk [vmem:[%s389_s1 + $0x8] sm:$0xff] %vm130_vm7, %v139_v58   ;;  %131 = vst.msk [vmem:[%s389_s1] sm:$0xff] %vm130_vm7, %v129_v59  }
  0x8e   :  { %v160_v60 = vpop.permute.xlu1 %159   ;;  %v150_v61 = vpop.permute.xlu0 %149  }
  0x8f   :  { %201 = vst.msk [vmem:[%s389_s1 + $0x8] sm:$0xff] %vm151_vm8, %v160_v60   ;;  %152 = vst.msk [vmem:[%s389_s1] sm:$0xff] %vm151_vm8, %v150_v61  }

// kernel: inference_forward.1
= control target key start
LH: loop header
LB: loop body
LE: loop exit
PB: predicated region body
PF: predicated region fallthrough
CT: control target
= control target key end

     0   :  { %v1990_v3 = vmov 0.0   ;;  %vm1288_vm0 = vmmov 0   ;;  %vm439_vm1 = vcmask 130112   ;;  %vm504_vm2 = vcmask 1041409   ;;  %s1982_s2 = inlined_call_operand.vmem [shape: f32[128,512], index: 2, kind: input, shape index: {}]   ;;  %s1983_s0 = inlined_call_operand.vmem [shape: f32[8,128], index: 0, kind: input, shape index: {}]   ;;  %s1984_s3 = inlined_call_operand.vmem [shape: f32[1,512], index: 3, kind: input, shape index: {}]   ;;  %s1985_s1 = inlined_call_operand.vmem [shape: f32[8,16,128], index: 1, kind: input, shape index: {}]   ;;  %s1986_s4 = inlined_call_operand.vmem [shape: f32[16,128], index: 4, kind: input, shape index: {}]   ;;  %s1987_s5 = inlined_call_operand.vmem [shape: f32[16,128], index: 5, kind: input, shape index: {}]   ;;  %s1988_s6 = inlined_call_operand.vmem [shape: f32[1,128], index: 6, kind: input, shape index: {}]   ;;  %s1989_s7 = inlined_call_operand.vmem [shape: f32[8,128], index: 7, kind: output, shape index: {}]  }
   0x1   :  { %v88_v0 = vld [vmem:[%s1982_s2 + $0x1e8] sm:$0xff]  ;;  %v90_v1 = vld [vmem:[%s1982_s2 + $0x1f8] sm:$0xff]  ;;  %v87_v2 = vld [vmem:[%s1982_s2 + $0x1e0] sm:$0xff]  ;;  %177 = vmatprep.mubr.f32.mxu0 %v1990_v3  ;;  %248 = vmatprep.mubr.f32.mxu1 %v1990_v3  ;;  %vm506_vm3 = vcmask 1042434   ;;  %vm508_vm4 = vcmask 1043459   ;;  %vm510_vm5 = vcmask 1044484  }
   0x2   :  { %113 = vmatprep.subr.mxu0 %v88_v0  ;;  %184 = vmatprep.subr.mxu1 %v90_v1  ;;  %v89_v4 = vld [vmem:[%s1982_s2 + $0x1f0] sm:$0xff]  ;;  %v84_v5 = vld [vmem:[%s1982_s2 + $0x1c8] sm:$0xff]  ;;  %v86_v6 = vld [vmem:[%s1982_s2 + $0x1d8] sm:$0xff]  ;;  %vm512_vm6 = vcmask 1045509   ;;  %vm514_vm7 = vcmask 1046534   ;;  %vm516_vm8 = vcmask 1047559  }
   0x3   :  { %114 = vmatpush1.msra.mxu0 %v87_v2  ;;  %185 = vmatpush1.msra.mxu1 %v89_v4  ;;  %v83_v7 = vld [vmem:[%s1982_s2 + $0x1c0] sm:$0xff]  ;;  %v85_v8 = vld [vmem:[%s1982_s2 + $0x1d0] sm:$0xff]  ;;  %v80_v9 = vld [vmem:[%s1982_s2 + $0x1a8] sm:$0xff]  ;;  %v93_v2 = vlaneseq  ;;  %vm518_vm9 = vcmask 130048  }
   0x4   :  { %115 = vmatprep.subr.mxu0 %v84_v5  ;;  %186 = vmatprep.subr.mxu1 %v86_v6  ;;  %v82_v10 = vld [vmem:[%s1982_s2 + $0x1b8] sm:$0xff]  ;;  %v79_v11 = vld [vmem:[%s1982_s2 + $0x1a0] sm:$0xff]  ;;  %v81_v12 = vld [vmem:[%s1982_s2 + $0x1b0] sm:$0xff] }
   0x5   :  { %116 = vmatpush1.msra.mxu0 %v83_v7  ;;  %187 = vmatpush1.msra.mxu1 %v85_v8  ;;  %v76_v13 = vld [vmem:[%s1982_s2 + $0x188] sm:$0xff]  ;;  %v78_v14 = vld [vmem:[%s1982_s2 + $0x198] sm:$0xff]  ;;  %v75_v15 = vld [vmem:[%s1982_s2 + $0x180] sm:$0xff]  ;;  %v1529_v4 = vshrl.u32 %v93_v2, 7  ;;  %v1287_v7 = vmov 1966171168  }
   0x6   :  { %117 = vmatprep.subr.mxu0 %v80_v9  ;;  %188 = vmatprep.subr.mxu1 %v82_v10  ;;  %v77_v16 = vld [vmem:[%s1982_s2 + $0x190] sm:$0xff]  ;;  %v72_v17 = vld [vmem:[%s1982_s2 + $0x168] sm:$0xff]  ;;  %v74_v18 = vld [vmem:[%s1982_s2 + $0x178] sm:$0xff]  ;;  %v277_v8 = vunpack.c.l.s4 %v1287_v7 }
   0x7   :  { %118 = vmatpush1.msra.mxu0 %v79_v11  ;;  %189 = vmatpush1.msra.mxu1 %v81_v12  ;;  %v71_v19 = vld [vmem:[%s1982_s2 + $0x160] sm:$0xff]  ;;  %v73_v20 = vld [vmem:[%s1982_s2 + $0x170] sm:$0xff]  ;;  %v68_v21 = vld [vmem:[%s1982_s2 + $0x148] sm:$0xff]  ;;  %v1532_v5 = vsub.s32 0, %v1529_v4  ;;  %v107_v6 = vsub.s32 3, %v1529_v4 }
   0x8   :  { %119 = vmatprep.subr.mxu0 %v76_v13  ;;  %190 = vmatprep.subr.mxu1 %v78_v14  ;;  %v70_v22 = vld [vmem:[%s1982_s2 + $0x158] sm:$0xff]  ;;  %v67_v23 = vld [vmem:[%s1982_s2 + $0x140] sm:$0xff]  ;;  %v69_v24 = vld [vmem:[%s1982_s2 + $0x150] sm:$0xff]  ;;  %v278_v12 = vunpack.c.0.s8 %v277_v8 }
   0x9   :  { %120 = vmatpush1.msra.mxu0 %v75_v15  ;;  %191 = vmatpush1.msra.mxu1 %v77_v16  ;;  %v64_v25 = vld [vmem:[%s1982_s2 + $0x128] sm:$0xff]  ;;  %v66_v26 = vld [vmem:[%s1982_s2 + $0x138] sm:$0xff]  ;;  %v63_v27 = vld [vmem:[%s1982_s2 + $0x120] sm:$0xff] }
   0xa   :  { %121 = vmatprep.subr.mxu0 %v72_v17  ;;  %192 = vmatprep.subr.mxu1 %v74_v18  ;;  %v65_v28 = vld [vmem:[%s1982_s2 + $0x130] sm:$0xff]  ;;  %v60_v29 = vld [vmem:[%s1982_s2 + $0x108] sm:$0xff]  ;;  %v62_v30 = vld [vmem:[%s1982_s2 + $0x118] sm:$0xff]  ;;  %v1546_v18 = vsub.s32 %v278_v12, %v1529_v4 }
   0xb   :  { %122 = vmatpush1.msra.mxu0 %v71_v19  ;;  %193 = vmatpush1.msra.mxu1 %v73_v20  ;;  %v59_v31 = vld [vmem:[%s1982_s2 + $0x100] sm:$0xff]  ;;  %v61_v32 = vld [vmem:[%s1982_s2 + $0x110] sm:$0xff]  ;;  %v56_v33 = vld [vmem:[%s1982_s2 + $0xe8] sm:$0xff] }
   0xc   :  { %123 = vmatprep.subr.mxu0 %v68_v21  ;;  %194 = vmatprep.subr.mxu1 %v70_v22  ;;  %v58_v34 = vld [vmem:[%s1982_s2 + $0xf8] sm:$0xff]  ;;  %v55_v35 = vld [vmem:[%s1982_s2 + $0xe0] sm:$0xff]  ;;  %v57_v36 = vld [vmem:[%s1982_s2 + $0xf0] sm:$0xff] }
   0xd   :  { %124 = vmatpush1.msra.mxu0 %v67_v23  ;;  %195 = vmatpush1.msra.mxu1 %v69_v24  ;;  %v52_v37 = vld [vmem:[%s1982_s2 + $0xc8] sm:$0xff]  ;;  %v54_v38 = vld [vmem:[%s1982_s2 + $0xd8] sm:$0xff]  ;;  %v51_v39 = vld [vmem:[%s1982_s2 + $0xc0] sm:$0xff] }
   0xe   :  { %125 = vmatprep.subr.mxu0 %v64_v25  ;;  %196 = vmatprep.subr.mxu1 %v66_v26  ;;  %v53_v40 = vld [vmem:[%s1982_s2 + $0xd0] sm:$0xff]  ;;  %v48_v41 = vld [vmem:[%s1982_s2 + $0xa8] sm:$0xff]  ;;  %v50_v42 = vld [vmem:[%s1982_s2 + $0xb8] sm:$0xff] }
   0xf   :  { %126 = vmatpush1.msra.mxu0 %v63_v27  ;;  %197 = vmatpush1.msra.mxu1 %v65_v28  ;;  %v47_v43 = vld [vmem:[%s1982_s2 + $0xa0] sm:$0xff]  ;;  %v49_v44 = vld [vmem:[%s1982_s2 + $0xb0] sm:$0xff]  ;;  %v44_v45 = vld [vmem:[%s1982_s2 + $0x88] sm:$0xff] }
  0x10   :  { %127 = vmatprep.subr.mxu0 %v60_v29  ;;  %198 = vmatprep.subr.mxu1 %v62_v30  ;;  %v46_v46 = vld [vmem:[%s1982_s2 + $0x98] sm:$0xff]  ;;  %v43_v47 = vld [vmem:[%s1982_s2 + $0x80] sm:$0xff]  ;;  %v45_v48 = vld [vmem:[%s1982_s2 + $0x90] sm:$0xff] }
  0x11   :  { %128 = vmatpush1.msra.mxu0 %v59_v31  ;;  %199 = vmatpush1.msra.mxu1 %v61_v32  ;;  %v40_v49 = vld [vmem:[%s1982_s2 + $0x68] sm:$0xff]  ;;  %v42_v50 = vld [vmem:[%s1982_s2 + $0x78] sm:$0xff]  ;;  %v39_v51 = vld [vmem:[%s1982_s2 + $0x60] sm:$0xff] }
  0x12   :  { %129 = vmatprep.subr.mxu0 %v56_v33  ;;  %200 = vmatprep.subr.mxu1 %v58_v34  ;;  %v41_v52 = vld [vmem:[%s1982_s2 + $0x70] sm:$0xff]  ;;  %v36_v53 = vld [vmem:[%s1982_s2 + $0x48] sm:$0xff]  ;;  %v38_v54 = vld [vmem:[%s1982_s2 + $0x58] sm:$0xff] }
  0x13   :  { %130 = vmatpush1.msra.mxu0 %v55_v35  ;;  %201 = vmatpush1.msra.mxu1 %v57_v36  ;;  %v35_v55 = vld [vmem:[%s1982_s2 + $0x40] sm:$0xff]  ;;  %v37_v56 = vld [vmem:[%s1982_s2 + $0x50] sm:$0xff]  ;;  %v32_v57 = vld [vmem:[%s1982_s2 + $0x28] sm:$0xff] }
  0x14   :  { %131 = vmatprep.subr.mxu0 %v52_v37  ;;  %202 = vmatprep.subr.mxu1 %v54_v38  ;;  %v34_v58 = vld [vmem:[%s1982_s2 + $0x38] sm:$0xff]  ;;  %v31_v59 = vld [vmem:[%s1982_s2 + $0x20] sm:$0xff]  ;;  %v33_v60 = vld [vmem:[%s1982_s2 + $0x30] sm:$0xff] }
  0x15   :  { %132 = vmatpush1.msra.mxu0 %v51_v39  ;;  %203 = vmatpush1.msra.mxu1 %v53_v40  ;;  %v28_v61 = vld [vmem:[%s1982_s2 + $0x8] sm:$0xff]  ;;  %v30_v62 = vld [vmem:[%s1982_s2 + $0x18] sm:$0xff]  ;;  %v27_v63 = vld [vmem:[%s1982_s2] sm:$0xff] }
  0x16   :  { %133 = vmatprep.subr.mxu0 %v48_v41  ;;  %204 = vmatprep.subr.mxu1 %v50_v42  ;;  %v29_v0 = vld [vmem:[%s1982_s2 + $0x10] sm:$0xff]  ;;  %v26_v1 = vld [vmem:[%s1983_s0] sm:$0xff]  ;;  %v1568_v32 = vld [vmem:[%s1985_s1 + $0x8] sm:$0xff] }
  0x17   :  { %134 = vmatpush1.msra.mxu0 %v47_v43  ;;  %205 = vmatpush1.msra.mxu1 %v49_v44  ;;  %v1538_v9 = vld [vmem:[%s1984_s3] sm:$0xf]  ;;  %v1560_v27 = vld [vmem:[%s1985_s1 + $0x10] sm:$0xff]  ;;  %v1574_v34 = vld [vmem:[%s1985_s1 + $0x18] sm:$0xff] }
  0x18   :  { %135 = vmatprep.subr.mxu0 %v44_v45  ;;  %206 = vmatprep.subr.mxu1 %v46_v46  ;;  %v96_v10 = vrot.slane %v1538_v9, %v1532_v5  ;;  %v108_v11 = vrot.slane %v1538_v9, %v107_v6  ;;  %v1553_v24 = vld [vmem:[%s1985_s1] sm:$0xff]  ;;  %v1588_v40 = vld [vmem:[%s1985_s1 + $0x28] sm:$0xff]  ;;  %v1648_v8 = vld [vmem:[%s1985_s1 + $0x70] sm:$0xff] }
  0x19   :  { %136 = vmatpush1.msra.mxu0 %v43_v47  ;;  %207 = vmatpush1.msra.mxu1 %v45_v48  ;;  %v1582_v38 = vld [vmem:[%s1985_s1 + $0x20] sm:$0xff]  ;;  %v1601_v47 = vld [vmem:[%s1985_s1 + $0x48] sm:$0xff] }
  0x1a   :  { %137 = vmatprep.subr.mxu0 %v40_v49  ;;  %208 = vmatprep.subr.mxu1 %v42_v50  ;;  %v1595_v45 = vld [vmem:[%s1985_s1 + $0x40] sm:$0xff] }
  0x1b   :  { %138 = vmatpush1.msra.mxu0 %v39_v51  ;;  %209 = vmatpush1.msra.mxu1 %v41_v52  ;;  %v1609_v51 = vld [vmem:[%s1985_s1 + $0x30] sm:$0xff] }
  0x1c   :  { %139 = vmatprep.subr.mxu0 %v36_v53  ;;  %210 = vmatprep.subr.mxu1 %v38_v54  ;;  %v1615_v53 = vld [vmem:[%s1985_s1 + $0x38] sm:$0xff] }
  0x1d   :  { %140 = vmatpush1.msra.mxu0 %v35_v55  ;;  %211 = vmatpush1.msra.mxu1 %v37_v56 }
  0x1e   :  { %141 = vmatprep.subr.mxu0 %v32_v57  ;;  %212 = vmatprep.subr.mxu1 %v34_v58  ;;  %v1622_v57 = vld [vmem:[%s1985_s1 + $0x50] sm:$0xff] }
  0x1f   :  { %142 = vmatpush1.msra.mxu0 %v31_v59  ;;  %213 = vmatpush1.msra.mxu1 %v33_v60  ;;  %v1628_v59 = vld [vmem:[%s1985_s1 + $0x58] sm:$0xff] }
  0x20   :  { %143 = vmatprep.subr.mxu0 %v28_v61  ;;  %214 = vmatprep.subr.mxu1 %v30_v62 }
  0x21   :  { %144 = vmatpush1.msra.mxu0 %v27_v63  ;;  %215 = vmatpush1.msra.mxu1 %v29_v0  ;;  %v1635_v63 = vld [vmem:[%s1985_s1 + $0x60] sm:$0xff] }
  0x22   :  { %178 = vmatmul.mubr.f32.vlgmr.msra.gmra.mxu0 %v26_v1  ;;  %249 = vmatmul.mubr.f32.vlgmr.msra.gmra.mxu1 %v26_v1  ;;  %v1641_v1 = vld [vmem:[%s1985_s1 + $0x68] sm:$0xff] }
  0x23   :  { %1262 = vmatprep.subr.mxu0 %v1990_v3  ;;  %1269 = vmatprep.subr.mxu1 %v1990_v3 }
  0x24   :  { %1266 = vmatprep.mubr.msk.f32.mxu0 %vm1288_vm0, %v1990_v3  ;;  %1273 = vmatprep.mubr.msk.f32.mxu1 %vm1288_vm0, %v1990_v3 }
  0xe2   :  { %v179_v13 = vpop.f32.mrf.mxu0  ;;  %v1543_v14 = vpop.f32.mrf.mxu1 }
  0xe3   :  { %v180_v15 = vadd.f32 %v179_v13, %v96_v10 }
  0xe4   :  { %v252_v16 = vpop.f32.mrf.mxu1 }
  0xe5   :  { %v253_v17 = vadd.f32 %v252_v16, %v108_v11  ;;  %v1654_v11 = vld [vmem:[%s1985_s1 + $0x78] sm:$0xff]  ;;  %v271_v16 = vld [vmem:[%s1986_s4] sm:$0xff] }
  0xe7   :  { %v273_v19 = vmul.f32 %v253_v17, %v180_v15  ;;  %v272_v15 = vld [vmem:[%s1986_s4 + $0x8] sm:$0xff] }
  0xe8   :  { %1263 = vmatpush3.msra.mxu0 %v272_v15  ;;  %1270 = vmatpush3.msra.mxu1 %v272_v15 }
  0xe9   :  { %v282_v20 = vrot.slane %v273_v19, %v1546_v18  ;;  %v275_v21 = vcombine.high %v273_v19, %v273_v19  ;;  %1264 = vmatprep.subr.mxu0 %v1990_v3  ;;  %1271 = vmatprep.subr.mxu1 %v1990_v3 }
  0xea   :  { %1265 = vmatpush3.msra.mxu0 %v271_v16  ;;  %1272 = vmatpush3.msra.mxu1 %v271_v16 }
  0xeb   :  { %v298_v22 = vrot.slane %v282_v20, %v1546_v18  ;;  %v290_v23 = vcombine.high %v282_v20, %v282_v20  ;;  %v289_v28 = vrot.slane %v275_v21, %v1546_v18  ;;  %1276 = vmatprep.subr.mxu0 %v1990_v3 }
  0xed   :  { %v327_v25 = vrot.slane %v298_v22, %v1532_v5  ;;  %v312_v26 = vrot.slane %v290_v23, %v1546_v18  ;;  %v320_v31 = vcombine.high %v298_v22, %v298_v22  ;;  %v305_v37 = vrot.slane %v289_v28, %v1546_v18 }
  0xee   :  { %v291_v44 = vcombine.high %v289_v28, %v289_v28 }
  0xef   :  { %v364_v29 = vmul.f32 %v327_v25, %v1553_v24  ;;  %v331_v30 = vrot.slane %v312_v26, %v1532_v5  ;;  %v365_v35 = vmul.f32 %v327_v25, %v1568_v32  ;;  %v335_v36 = vrot.slane %v320_v31, %v1532_v5 }
  0xf0   :  { %v343_v42 = vrot.slane %v305_v37, %v1532_v5  ;;  %v322_v43 = vcombine.high %v312_v26, %v312_v26  ;;  %v319_v50 = vrot.slane %v291_v44, %v1546_v18  ;;  %v321_v56 = vcombine.high %v305_v37, %v305_v37 }
  0xf1   :  { %380 = vadd.xlane.f32.xlu0 %v364_v29  ;;  %v366_v33 = vmul.f32 %v331_v30, %v1560_v27  ;;  %v367_v39 = vmul.f32 %v331_v30, %v1574_v34  ;;  %v368_v41 = vmul.f32 %v335_v36, %v1582_v38  ;;  %v369_v46 = vmul.f32 %v335_v36, %v1588_v40 }
  0xf2   :  { %v372_v48 = vmul.f32 %v343_v42, %v1595_v45  ;;  %v339_v49 = vrot.slane %v322_v43, %v1532_v5  ;;  %v373_v52 = vmul.f32 %v343_v42, %v1601_v47  ;;  %v347_v55 = vrot.slane %v319_v50, %v1532_v5 }
  0xf3   :  { %384 = vadd.xlane.f32.xlu1 %v366_v33  ;;  %v351_v61 = vrot.slane %v321_v56, %v1532_v5  ;;  %v323_v62 = vcombine.high %v319_v50, %v319_v50  ;;  %v429_v25 = vand.u32 127, %v93_v2 }
  0xf4   :  { %v370_v54 = vmul.f32 %v339_v49, %v1609_v51  ;;  %v371_v58 = vmul.f32 %v339_v49, %v1615_v53  ;;  %v374_v60 = vmul.f32 %v347_v55, %v1622_v57  ;;  %v375_v0 = vmul.f32 %v347_v55, %v1628_v59 }
  0xf5   :  { %382 = vadd.xlane.f32.xlu0 %v365_v35  ;;  %v376_v6 = vmul.f32 %v351_v61, %v1635_v63  ;;  %v355_v7 = vrot.slane %v323_v62, %v1532_v5  ;;  %v377_v10 = vmul.f32 %v351_v61, %v1641_v1  ;;  %v434_v28 = vadd.s32 4294967288, %v429_v25 }
  0xf6   :  { %v1696_v35 = vsub.s32 %v429_v25, %v1529_v4 }
  0xf7   :  { %386 = vadd.xlane.f32.xlu1 %v367_v39  ;;  %v378_v12 = vmul.f32 %v355_v7, %v1648_v8  ;;  %v379_v13 = vmul.f32 %v355_v7, %v1654_v11  ;;  %v1691_v31 = vsub.s32 %v434_v28, %v1529_v4 }
  0xf9   :  { %388 = vadd.xlane.f32.xlu0 %v368_v41 }
  0xfb   :  { %390 = vadd.xlane.f32.xlu1 %v369_v46 }
  0xfd   :  { %396 = vadd.xlane.f32.xlu0 %v372_v48 }
  0xff   :  { %398 = vadd.xlane.f32.xlu1 %v373_v52 }
 0x101   :  { %392 = vadd.xlane.f32.xlu0 %v370_v54 }
 0x103   :  { %394 = vadd.xlane.f32.xlu1 %v371_v58 }
 0x105   :  { %400 = vadd.xlane.f32.xlu0 %v374_v60 }
 0x107   :  { %402 = vadd.xlane.f32.xlu1 %v375_v0 }
 0x109   :  { %404 = vadd.xlane.f32.xlu0 %v376_v6 }
 0x10b   :  { %406 = vadd.xlane.f32.xlu1 %v377_v10 }
 0x10d   :  { %408 = vadd.xlane.f32.xlu0 %v378_v12 }
 0x10f   :  { %410 = vadd.xlane.f32.xlu1 %v379_v13 }
 0x17a   :  { %v1671_v17 = vpop.xlane.xlu0 %380 }
 0x17b   :  { %v433_v46 = vrot.slane %v1671_v17, %v1696_v35 }
 0x17c   :  { %v1673_v19 = vpop.xlane.xlu1 %384 }
 0x17d   :  { %v444_v39 = vrot.slane %v1673_v19, %v1696_v35 }
 0x17e   :  { %v1675_v20 = vpop.xlane.xlu0 %382 }
 0x17f   :  { %v438_v41 = vrot.slane %v1675_v20, %v1691_v31 }
 0x180   :  { %v1677_v21 = vpop.xlane.xlu1 %386 }
 0x181   :  { %v448_v36 = vrot.slane %v1677_v21, %v1691_v31  ;;  %v440_v54 = vsel %vm439_vm1, %v438_v41, %v433_v46 }
 0x182   :  { %v1679_v22 = vpop.xlane.xlu0 %388 }
 0x183   :  { %v453_v43 = vrot.slane %v1679_v22, %v1696_v35  ;;  %v449_v48 = vsel %vm439_vm1, %v448_v36, %v444_v39 }
 0x184   :  { %v1681_v23 = vpop.xlane.xlu1 %390  ;;  %v505_v58 = vsel %vm504_vm2, %v449_v48, %v440_v54  ;;  %v99_v48 = vsub.s32 1, %v1529_v4 }
 0x185   :  { %v457_v2 = vrot.slane %v1681_v23, %v1691_v31 }
 0x186   :  { %v1684_v26 = vpop.xlane.xlu0 %396 }
 0x187   :  { %v458_v50 = vsel %vm439_vm1, %v457_v2, %v453_v43  ;;  %v471_v7 = vrot.slane %v1684_v26, %v1696_v35 }
 0x188   :  { %v1686_v29 = vpop.xlane.xlu1 %398  ;;  %v507_v62 = vsel %vm506_vm3, %v458_v50, %v505_v58  ;;  %v181_v50 = vpop.f32.mrf.mxu0 }
 0x189   :  { %v475_v60 = vrot.slane %v1686_v29, %v1691_v31 }
 0x18a   :  { %v1688_v30 = vpop.xlane.xlu0 %392 }
 0x18b   :  { %v462_v49 = vrot.slane %v1688_v30, %v1696_v35  ;;  %v476_v16 = vsel %vm439_vm1, %v475_v60, %v471_v7 }
 0x18c   :  { %v1693_v33 = vpop.xlane.xlu1 %394 }
 0x18d   :  { %v466_v42 = vrot.slane %v1693_v33, %v1691_v31 }
 0x18e   :  { %v1702_v37 = vpop.xlane.xlu0 %400 }
 0x18f   :  { %v467_v55 = vsel %vm439_vm1, %v466_v42, %v462_v49  ;;  %v480_v0 = vrot.slane %v1702_v37, %v1696_v35  ;;  %v100_v49 = vrot.slane %v1538_v9, %v99_v48 }
 0x190   :  { %v1712_v44 = vpop.xlane.xlu1 %402  ;;  %v509_v10 = vsel %vm508_vm4, %v467_v55, %v507_v62 }
 0x191   :  { %v484_v56 = vrot.slane %v1712_v44, %v1691_v31  ;;  %v511_v36 = vsel %vm510_vm5, %v476_v16, %v509_v10  ;;  %v182_v54 = vadd.f32 %v181_v50, %v100_v49 }
 0x192   :  { %v1720_v52 = vpop.xlane.xlu0 %404 }
 0x193   :  { %1998 = vst [vmem:[#allocation2_spill] sm:$0xff] %v1720_v52  ;;  %v489_v12 = vrot.slane %v1720_v52, %v1696_v35  ;;  %v485_v15 = vsel %vm439_vm1, %v484_v56, %v480_v0 }
 0x194   :  { %v1729_v61 = vpop.xlane.xlu1 %406  ;;  %v513_v41 = vsel %vm512_vm6, %v485_v15, %v511_v36 }
 0x195   :  { %1999 = vst [vmem:[#allocation3_spill] sm:$0xff] %v1729_v61  ;;  %v493_v6 = vrot.slane %v1729_v61, %v1691_v31 }
 0x196   :  { %v1741_v13 = vpop.xlane.xlu0 %408 }
 0x197   :  { %2000 = vst [vmem:[#allocation4_spill] sm:$0xff] %v1741_v13  ;;  %v494_v25 = vsel %vm439_vm1, %v493_v6, %v489_v12  ;;  %v498_v2 = vrot.slane %v1741_v13, %v1696_v35 }
 0x198   :  { %v1746_v28 = vpop.xlane.xlu1 %410  ;;  %v515_v43 = vsel %vm514_vm7, %v494_v25, %v513_v41 }
 0x199   :  { %2001 = vst [vmem:[#allocation5_spill] sm:$0xff] %v1746_v28  ;;  %v502_v39 = vrot.slane %v1746_v28, %v1691_v31 }
 0x19b   :  { %v503_v42 = vsel %vm439_vm1, %v502_v39, %v498_v2 }
 0x19c   :  { %v517_v46 = vsel %vm516_vm8, %v503_v42, %v515_v43 }
 0x19d   :  { %1267 = vmatmul.mubr.msk.f32.vlgmr.msra.gmra.mxu0 %vm518_vm9, %v517_v46 }
 0x19e   :  { %1280 = vmatprep.mubr.msk.f32.mxu0 %vm1288_vm0, %v1990_v3 }
 0x25d   :  { %v587_v55 = vpop.f32.mrf.mxu0 }
 0x25e   :  { %v591_v56 = vmul.f32 %v587_v55, %v182_v54 }
 0x25f   :  { %v1268_v58 = vpop.f32.mrf.mxu0 }
 0x260   :  { %v600_v60 = vrot.slane %v591_v56, %v1546_v18  ;;  %v593_v62 = vcombine.high %v591_v56, %v591_v56 }
 0x262   :  { %v608_v0 = vcombine.high %v600_v60, %v600_v60  ;;  %v616_v6 = vrot.slane %v600_v60, %v1546_v18  ;;  %v607_v12 = vrot.slane %v593_v62, %v1546_v18 }
 0x264   :  { %v645_v7 = vrot.slane %v616_v6, %v1532_v5  ;;  %v630_v10 = vrot.slane %v608_v0, %v1546_v18  ;;  %v638_v36 = vcombine.high %v616_v6, %v616_v6  ;;  %v623_v42 = vrot.slane %v607_v12, %v1546_v18 }
 0x265   :  { %v609_v43 = vcombine.high %v607_v12, %v607_v12 }
 0x266   :  { %v683_v15 = vmul.f32 %v645_v7, %v1568_v32  ;;  %v682_v16 = vmul.f32 %v645_v7, %v1553_v24  ;;  %v649_v25 = vrot.slane %v630_v10, %v1532_v5  ;;  %v653_v41 = vrot.slane %v638_v36, %v1532_v5 }
 0x267   :  { %v661_v49 = vrot.slane %v623_v42, %v1532_v5  ;;  %v640_v50 = vcombine.high %v630_v10, %v630_v10  ;;  %v637_v58 = vrot.slane %v609_v43, %v1546_v18  ;;  %v639_v6 = vcombine.high %v623_v42, %v623_v42 }
 0x268   :  { %700 = vadd.xlane.f32.xlu1 %v683_v15  ;;  %698 = vadd.xlane.f32.xlu0 %v682_v16  ;;  %v685_v2 = vmul.f32 %v649_v25, %v1574_v34  ;;  %v684_v39 = vmul.f32 %v649_v25, %v1560_v27  ;;  %v687_v46 = vmul.f32 %v653_v41, %v1588_v40 }
 0x269   :  { %v686_v48 = vmul.f32 %v653_v41, %v1582_v38  ;;  %v691_v54 = vmul.f32 %v661_v49, %v1601_v47  ;;  %v690_v55 = vmul.f32 %v661_v49, %v1595_v45  ;;  %v657_v56 = vrot.slane %v640_v50, %v1532_v5 }
 0x26a   :  { %v665_v0 = vrot.slane %v637_v58, %v1532_v5  ;;  %v669_v12 = vrot.slane %v639_v6, %v1532_v5  ;;  %v641_v15 = vcombine.high %v637_v58, %v637_v58 }
 0x26b   :  { %v689_v60 = vmul.f32 %v657_v56, %v1615_v53  ;;  %v688_v62 = vmul.f32 %v657_v56, %v1609_v51 }
 0x26c   :  { %704 = vadd.xlane.f32.xlu1 %v685_v2  ;;  %702 = vadd.xlane.f32.xlu0 %v684_v39  ;;  %v693_v7 = vmul.f32 %v665_v0, %v1628_v59  ;;  %v692_v10 = vmul.f32 %v665_v0, %v1622_v57  ;;  %v695_v16 = vmul.f32 %v669_v12, %v1641_v1 }
 0x26d   :  { %v694_v25 = vmul.f32 %v669_v12, %v1635_v63  ;;  %v673_v36 = vrot.slane %v641_v15, %v1532_v5 }
 0x26f   :  { %v697_v2 = vmul.f32 %v673_v36, %v1654_v11  ;;  %v696_v39 = vmul.f32 %v673_v36, %v1648_v8 }
 0x270   :  { %708 = vadd.xlane.f32.xlu1 %v687_v46  ;;  %706 = vadd.xlane.f32.xlu0 %v686_v48 }
 0x274   :  { %716 = vadd.xlane.f32.xlu1 %v691_v54  ;;  %714 = vadd.xlane.f32.xlu0 %v690_v55 }
 0x278   :  { %712 = vadd.xlane.f32.xlu1 %v689_v60  ;;  %710 = vadd.xlane.f32.xlu0 %v688_v62 }
 0x27c   :  { %720 = vadd.xlane.f32.xlu1 %v693_v7  ;;  %718 = vadd.xlane.f32.xlu0 %v692_v10 }
 0x280   :  { %724 = vadd.xlane.f32.xlu1 %v695_v16  ;;  %722 = vadd.xlane.f32.xlu0 %v694_v25 }
 0x284   :  { %728 = vadd.xlane.f32.xlu1 %v697_v2  ;;  %726 = vadd.xlane.f32.xlu0 %v696_v39 }
 0x2f1   :  { %v1792_v41 = vpop.xlane.xlu1 %700  ;;  %v1794_v42 = vpop.xlane.xlu0 %698 }
 0x2f2   :  { %v753_v6 = vrot.slane %v1792_v41, %v1691_v31  ;;  %v749_v7 = vrot.slane %v1794_v42, %v1696_v35 }
 0x2f4   :  { %v754_v2 = vsel %vm439_vm1, %v753_v6, %v749_v7 }
 0x2f5   :  { %v1796_v43 = vpop.xlane.xlu1 %704  ;;  %v1798_v46 = vpop.xlane.xlu0 %702 }
 0x2f6   :  { %v762_v58 = vrot.slane %v1796_v43, %v1691_v31  ;;  %v758_v60 = vrot.slane %v1798_v46, %v1696_v35 }
 0x2f8   :  { %v763_v25 = vsel %vm439_vm1, %v762_v58, %v758_v60 }
 0x2f9   :  { %v1800_v48 = vpop.xlane.xlu1 %708  ;;  %v1802_v49 = vpop.xlane.xlu0 %706  ;;  %v818_v28 = vsel %vm504_vm2, %v763_v25, %v754_v2 }
 0x2fa   :  { %v771_v62 = vrot.slane %v1800_v48, %v1691_v31  ;;  %v767_v0 = vrot.slane %v1802_v49, %v1696_v35 }
 0x2fc   :  { %v772_v36 = vsel %vm439_vm1, %v771_v62, %v767_v0 }
 0x2fd   :  { %v1804_v50 = vpop.xlane.xlu1 %716  ;;  %v1806_v54 = vpop.xlane.xlu0 %714  ;;  %v819_v0 = vsel %vm506_vm3, %v772_v36, %v818_v28 }
 0x2fe   :  { %v789_v52 = vrot.slane %v1804_v50, %v1691_v31  ;;  %v785_v58 = vrot.slane %v1806_v54, %v1696_v35 }
 0x300   :  { %v790_v25 = vsel %vm439_vm1, %v789_v52, %v785_v58  ;;  %v103_v58 = vsub.s32 2, %v1529_v4 }
 0x301   :  { %v1808_v55 = vpop.xlane.xlu1 %712  ;;  %v1810_v56 = vpop.xlane.xlu0 %710 }
 0x302   :  { %v780_v10 = vrot.slane %v1808_v55, %v1691_v31  ;;  %v776_v12 = vrot.slane %v1810_v56, %v1696_v35 }
 0x304   :  { %v781_v39 = vsel %vm439_vm1, %v780_v10, %v776_v12 }
 0x305   :  { %v1828_v15 = vpop.xlane.xlu1 %720  ;;  %v1830_v16 = vpop.xlane.xlu0 %718  ;;  %v820_v10 = vsel %vm508_vm4, %v781_v39, %v819_v0  ;;  %v104_v0 = vrot.slane %v1538_v9, %v103_v58 }
 0x306   :  { %2002 = vst [vmem:[#allocation6_spill] sm:$0xff] %v1830_v16  ;;  %v798_v3 = vrot.slane %v1828_v15, %v1691_v31  ;;  %v794_v13 = vrot.slane %v1830_v16, %v1696_v35  ;;  %v821_v28 = vsel %vm510_vm5, %v790_v25, %v820_v10 }
 0x308   :  { %v799_v12 = vsel %vm439_vm1, %v798_v3, %v794_v13 }
 0x309   :  { %v1845_v60 = vpop.xlane.xlu1 %724  ;;  %v1847_v62 = vpop.xlane.xlu0 %722  ;;  %v822_v39 = vsel %vm512_vm6, %v799_v12, %v821_v28 }
 0x30a   :  { %2003 = vst [vmem:[#allocation7_spill] sm:$0xff] %v1847_v62  ;;  %v807_v6 = vrot.slane %v1845_v60, %v1691_v31  ;;  %v803_v7 = vrot.slane %v1847_v62, %v1696_v35 }
 0x30c   :  { %v808_v2 = vsel %vm439_vm1, %v807_v6, %v803_v7  ;;  %v251_v6 = vadd.f32 %v1543_v14, %v104_v0 }
 0x30d   :  { %v1858_v61 = vpop.xlane.xlu1 %728  ;;  %v1860_v16 = vpop.xlane.xlu0 %726  ;;  %v823_v52 = vsel %vm514_vm7, %v808_v2, %v822_v39 }
 0x30e   :  { %2004 = vst [vmem:[#allocation8_spill] sm:$0xff] %v1860_v16  ;;  %v816_v36 = vrot.slane %v1858_v61, %v1691_v31  ;;  %v812_v62 = vrot.slane %v1860_v16, %v1696_v35 }
 0x310   :  { %v817_v3 = vsel %vm439_vm1, %v816_v36, %v812_v62 }
 0x311   :  { %v824_v13 = vsel %vm516_vm8, %v817_v3, %v823_v52 }
 0x312   :  { %1274 = vmatmul.mubr.msk.f32.vlgmr.msra.gmra.mxu1 %vm518_vm9, %v824_v13 }
 0x3d2   :  { %v893_v7 = vpop.f32.mrf.mxu1 }
 0x3d3   :  { %v897_v10 = vmul.f32 %v893_v7, %v251_v6 }
 0x3d4   :  { %v1275_v25 = vpop.f32.mrf.mxu1 }
 0x3d5   :  { %v906_v16 = vrot.slane %v897_v10, %v1546_v18  ;;  %v899_v12 = vcombine.high %v897_v10, %v897_v10 }
 0x3d7   :  { %v914_v28 = vcombine.high %v906_v16, %v906_v16  ;;  %v922_v62 = vrot.slane %v906_v16, %v1546_v18  ;;  %v913_v39 = vrot.slane %v899_v12, %v1546_v18 }
 0x3d9   :  { %v951_v2 = vrot.slane %v922_v62, %v1532_v5  ;;  %v936_v36 = vrot.slane %v914_v28, %v1546_v18  ;;  %v944_v3 = vcombine.high %v922_v62, %v922_v62  ;;  %v929_v58 = vrot.slane %v913_v39, %v1546_v18 }
 0x3da   :  { %v915_v0 = vcombine.high %v913_v39, %v913_v39 }
 0x3db   :  { %v989_v4 = vmul.f32 %v951_v2, %v1568_v32  ;;  %v988_v9 = vmul.f32 %v951_v2, %v1553_v24  ;;  %v955_v14 = vrot.slane %v936_v36, %v1532_v5  ;;  %v959_v16 = vrot.slane %v944_v3, %v1532_v5 }
 0x3dc   :  { %v967_v6 = vrot.slane %v929_v58, %v1532_v5  ;;  %v946_v7 = vcombine.high %v936_v36, %v936_v36  ;;  %v943_v25 = vrot.slane %v915_v0, %v1546_v18  ;;  %v945_v28 = vcombine.high %v929_v58, %v929_v58 }
 0x3dd   :  { %1006 = vadd.xlane.f32.xlu1 %v989_v4  ;;  %1004 = vadd.xlane.f32.xlu0 %v988_v9  ;;  %v991_v52 = vmul.f32 %v955_v14, %v1574_v34  ;;  %v990_v13 = vmul.f32 %v955_v14, %v1560_v27  ;;  %v993_v32 = vmul.f32 %v959_v16, %v1588_v40 }
 0x3de   :  { %v992_v24 = vmul.f32 %v959_v16, %v1582_v38  ;;  %v997_v34 = vmul.f32 %v967_v6, %v1601_v47  ;;  %v996_v27 = vmul.f32 %v967_v6, %v1595_v45  ;;  %v963_v10 = vrot.slane %v946_v7, %v1532_v5 }
 0x3df   :  { %v971_v38 = vrot.slane %v943_v25, %v1532_v5  ;;  %v975_v45 = vrot.slane %v945_v28, %v1532_v5  ;;  %v947_v2 = vcombine.high %v943_v25, %v943_v25  ;;  %v1039_v14 = vadd.f32 %v1796_v43, %v1677_v21 }
 0x3e0   :  { %v995_v12 = vmul.f32 %v963_v10, %v1615_v53  ;;  %v994_v40 = vmul.f32 %v963_v10, %v1609_v51  ;;  %v1038_v3 = vadd.f32 %v1798_v46, %v1673_v19  ;;  %v1040_v0 = vadd.f32 %v1802_v49, %v1679_v22 }
 0x3e1   :  { %1010 = vadd.xlane.f32.xlu1 %v991_v52  ;;  %1008 = vadd.xlane.f32.xlu0 %v990_v13  ;;  %v999_v62 = vmul.f32 %v971_v38, %v1628_v59  ;;  %v998_v47 = vmul.f32 %v971_v38, %v1622_v57  ;;  %v1001_v18 = vmul.f32 %v975_v45, %v1641_v1  ;;  %v1069_v57 = vld [vmem:[%s1987_s5 + $0x8] sm:$0xff]  ;;  %v1068_v59 = vld [vmem:[%s1987_s5] sm:$0xff] }
 0x3e2   :  { %v1000_v53 = vmul.f32 %v975_v45, %v1635_v63  ;;  %v979_v51 = vrot.slane %v947_v2, %v1532_v5  ;;  %1277 = vmatpush3.msra.mxu0 %v1069_v57  ;;  %v2005_v63 = vmov 0.0   ;;  %v1037_v5 = vadd.f32 %v1792_v41, %v1675_v20  ;;  %v2007_v57 = vld [vmem:[#allocation3_spill] sm:$0xff] }
 0x3e3   :  { %1278 = vmatprep.subr.mxu0 %v2005_v63  ;;  %v1036_v1 = vadd.f32 %v1794_v42, %v1671_v17  ;;  %v1041_v42 = vadd.f32 %v1800_v48, %v1681_v23  ;;  %v1044_v23 = vadd.f32 %v1806_v54, %v1684_v26  ;;  %v1043_v38 = vadd.f32 %v1808_v55, %v1693_v33 }
 0x3e4   :  { %v1003_v36 = vmul.f32 %v979_v51, %v1654_v11  ;;  %v1002_v39 = vmul.f32 %v979_v51, %v1648_v8  ;;  %1279 = vmatpush3.msra.mxu0 %v1068_v59  ;;  %v1047_v2 = vadd.f32 %v1828_v15, %v1712_v44  ;;  %v1049_v59 = vadd.f32 %v1845_v60, %v2007_v57  ;;  %v2009_v44 = vld [vmem:[#allocation7_spill] sm:$0xff]  ;;  %v2010_v60 = vld [vmem:[#allocation5_spill] sm:$0xff] }
 0x3e5   :  { %1014 = vadd.xlane.f32.xlu1 %v993_v32  ;;  %1012 = vadd.xlane.f32.xlu0 %v992_v24 }
 0x3e9   :  { %1022 = vadd.xlane.f32.xlu1 %v997_v34  ;;  %1020 = vadd.xlane.f32.xlu0 %v996_v27  ;;  %v1045_v34 = vadd.f32 %v1804_v50, %v1686_v29  ;;  %v1042_v29 = vadd.f32 %v1810_v56, %v1688_v30 }
 0x3ed   :  { %1018 = vadd.xlane.f32.xlu1 %v995_v12  ;;  %1016 = vadd.xlane.f32.xlu0 %v994_v40 }
 0x3f1   :  { %1026 = vadd.xlane.f32.xlu1 %v999_v62  ;;  %1024 = vadd.xlane.f32.xlu0 %v998_v47 }
 0x3f5   :  { %1030 = vadd.xlane.f32.xlu1 %v1001_v18  ;;  %1028 = vadd.xlane.f32.xlu0 %v1000_v53  ;;  %v2006_v18 = vld [vmem:[#allocation6_spill] sm:$0xff] }
 0x3f6   :  { %v1046_v53 = vadd.f32 %v2006_v18, %v1702_v37 }
 0x3f9   :  { %1034 = vadd.xlane.f32.xlu1 %v1003_v36  ;;  %1032 = vadd.xlane.f32.xlu0 %v1002_v39 }
 0x466   :  { %v1007_v8 = vpop.xlane.xlu1 %1006  ;;  %v1005_v11 = vpop.xlane.xlu0 %1004 }
 0x467   :  { %v1053_v4 = vadd.f32 %v1037_v5, %v1007_v8  ;;  %v1052_v9 = vadd.f32 %v1036_v1, %v1005_v11  ;;  %v2008_v5 = vld [vmem:[#allocation2_spill] sm:$0xff] }
 0x468   :  { %v1048_v15 = vadd.f32 %v2009_v44, %v2008_v5 }
 0x469   :  { %v1100_v52 = vrot.slane %v1053_v4, %v1691_v31  ;;  %v1096_v13 = vrot.slane %v1052_v9, %v1696_v35 }
 0x46a   :  { %v1011_v16 = vpop.xlane.xlu1 %1010  ;;  %v1009_v58 = vpop.xlane.xlu0 %1008 }
 0x46b   :  { %v1101_v20 = vsel %vm439_vm1, %v1100_v52, %v1096_v13  ;;  %v1055_v41 = vadd.f32 %v1039_v14, %v1011_v16  ;;  %v1054_v17 = vadd.f32 %v1038_v3, %v1009_v58  ;;  %v1051_v13 = vadd.f32 %v1858_v61, %v2010_v60  ;;  %v2011_v16 = vld [vmem:[#allocation4_spill] sm:$0xff] }
 0x46c   :  { %v2012_v58 = vld [vmem:[#allocation8_spill] sm:$0xff] }
 0x46d   :  { %v1109_v21 = vrot.slane %v1055_v41, %v1691_v31  ;;  %v1105_v19 = vrot.slane %v1054_v17, %v1696_v35 }
 0x46e   :  { %v1015_v43 = vpop.xlane.xlu1 %1014  ;;  %v1013_v46 = vpop.xlane.xlu0 %1012 }
 0x46f   :  { %v1110_v32 = vsel %vm439_vm1, %v1109_v21, %v1105_v19  ;;  %v1057_v24 = vadd.f32 %v1041_v42, %v1015_v43  ;;  %v1056_v6 = vadd.f32 %v1040_v0, %v1013_v46 }
 0x470   :  { %v1165_v7 = vsel %vm504_vm2, %v1110_v32, %v1101_v20  ;;  %v1050_v20 = vadd.f32 %v2012_v58, %v2011_v16 }
 0x471   :  { %v1118_v22 = vrot.slane %v1057_v24, %v1691_v31  ;;  %v1114_v48 = vrot.slane %v1056_v6, %v1696_v35 }
 0x472   :  { %v1023_v49 = vpop.xlane.xlu1 %1022  ;;  %v1021_v27 = vpop.xlane.xlu0 %1020 }
 0x473   :  { %v1119_v10 = vsel %vm439_vm1, %v1118_v22, %v1114_v48  ;;  %v1061_v25 = vadd.f32 %v1045_v34, %v1023_v49  ;;  %v1060_v12 = vadd.f32 %v1044_v23, %v1021_v27 }
 0x474   :  { %v1166_v40 = vsel %vm506_vm3, %v1119_v10, %v1165_v7  ;;  %v1251_v7 = vld [vmem:[%s1988_s6] ss:$0 sm:$0xff] }
 0x475   :  { %v1136_v26 = vrot.slane %v1061_v25, %v1691_v31  ;;  %v1132_v50 = vrot.slane %v1060_v12, %v1696_v35 }
 0x476   :  { %v1019_v54 = vpop.xlane.xlu1 %1018  ;;  %v1017_v28 = vpop.xlane.xlu0 %1016 }
 0x477   :  { %v1137_v62 = vsel %vm439_vm1, %v1136_v26, %v1132_v50  ;;  %v1059_v47 = vadd.f32 %v1043_v38, %v1019_v54  ;;  %v1058_v45 = vadd.f32 %v1042_v29, %v1017_v28 }
 0x479   :  { %v1127_v33 = vrot.slane %v1059_v47, %v1691_v31  ;;  %v1123_v30 = vrot.slane %v1058_v45, %v1696_v35 }
 0x47a   :  { %v1027_v55 = vpop.xlane.xlu1 %1026  ;;  %v1025_v56 = vpop.xlane.xlu0 %1024 }
 0x47b   :  { %v1128_v51 = vsel %vm439_vm1, %v1127_v33, %v1123_v30  ;;  %v1063_v36 = vadd.f32 %v1047_v2, %v1027_v55  ;;  %v1062_v39 = vadd.f32 %v1046_v53, %v1025_v56 }
 0x47c   :  { %v1167_v63 = vsel %vm508_vm4, %v1128_v51, %v1166_v40 }
 0x47d   :  { %v1145_v37 = vrot.slane %v1063_v36, %v1691_v31  ;;  %v1168_v1 = vsel %vm510_vm5, %v1137_v62, %v1167_v63  ;;  %v1141_v8 = vrot.slane %v1062_v39, %v1696_v35 }
 0x47e   :  { %v1031_v11 = vpop.xlane.xlu1 %1030  ;;  %v1029_v4 = vpop.xlane.xlu0 %1028 }
 0x47f   :  { %v1146_v9 = vsel %vm439_vm1, %v1145_v37, %v1141_v8  ;;  %v1065_v14 = vadd.f32 %v1049_v59, %v1031_v11  ;;  %v1064_v3 = vadd.f32 %v1048_v15, %v1029_v4 }
 0x480   :  { %v1169_v52 = vsel %vm512_vm6, %v1146_v9, %v1168_v1 }
 0x481   :  { %v1154_v41 = vrot.slane %v1065_v14, %v1691_v31  ;;  %v1150_v17 = vrot.slane %v1064_v3, %v1696_v35 }
 0x482   :  { %v1035_v42 = vpop.xlane.xlu1 %1034  ;;  %v1033_v0 = vpop.xlane.xlu0 %1032 }
 0x483   :  { %v1155_v21 = vsel %vm439_vm1, %v1154_v41, %v1150_v17  ;;  %v1067_v19 = vadd.f32 %v1051_v13, %v1035_v42  ;;  %v1066_v43 = vadd.f32 %v1050_v20, %v1033_v0 }
 0x484   :  { %v1170_v46 = vsel %vm514_vm7, %v1155_v21, %v1169_v52 }
 0x485   :  { %v1163_v32 = vrot.slane %v1067_v19, %v1691_v31  ;;  %v1159_v24 = vrot.slane %v1066_v43, %v1696_v35 }
 0x487   :  { %v1164_v61 = vsel %vm439_vm1, %v1163_v32, %v1159_v24 }
 0x488   :  { %v1171_v6 = vsel %vm516_vm8, %v1164_v61, %v1170_v46 }
 0x489   :  { %1281 = vmatmul.mubr.msk.f32.vlgmr.msra.gmra.mxu0 %vm518_vm9, %v1171_v6 }
 0x549   :  { %v1240_v34 = vpop.f32.mrf.mxu0 }
 0x54a   :  { %v1241_v23 = vadd.f32 %v1251_v7, %v1240_v34 }
 0x54b   :  { %v1282_v22 = vpop.f32.mrf.mxu0 }
 0x54c   :  { %1244 = vst [vmem:[%s1989_s7] sm:$0xff] %v1241_v23 }

</bundles_post_ra>
